<compile_context>
chip_gen: v7x
topology: tpu7x:2x2x1
jax: 0.10.0
libtpu: 0.0.40
codegen_flags: <defaults>
</compile_context>

<pallas_src>
import jax
import jax.numpy as jnp
from jax.experimental import pallas as pl
from jax.experimental.pallas import tpu as pltpu


def _round_up(x, m):
    return (x + m - 1) // m * m


def _default_ew_dtype(mxu_dtype):
    """bf16 elementwise only where the VPU/EUP are bf16-capable (v6e/v7x)."""
    if jnp.dtype(mxu_dtype) == jnp.dtype(jnp.float32):
        return jnp.float32
    try:
        kind = jax.devices()[0].device_kind.lower()
    except Exception:
        return jnp.float32
    if any(tag in kind for tag in ("v2", "v3", "v4", "v5")):
        return jnp.float32  # v5e and older: no bf16 VPU/EUP
    return jnp.bfloat16


def _pick_tile(B, block_b):
    """Lane-aligned batch tile. Tiny batches: one full-array tile. Large
    batches: >=8 grid steps (keeps both v7x TensorCores busy, amortizes the
    ~0.35us/step overhead), capped at block_b. VMEM is never the constraint
    here (a (16, 8192) f32 tile is ~0.5 MiB)."""
    block_b = max(128, _round_up(block_b, 128))
    if B < 128:
        return _round_up(max(B, 1), 8)          # single tile == full array
    if B <= 1024:
        return min(block_b, _round_up(B, 128))
    return min(block_b, max(128, _round_up(pl.cdiv(B, 8), 128)))


def _make_kernel(mxu_dtype, ew_dtype):
    def kernel(x_ref, w1_ref, b1_ref, w2_ref, b2_ref, w3_ref, b3_ref, out_ref):
        # Batch-on-lanes: x is (obs_dim, tb); activations stay (hidden, tb).
        x = x_ref[...].astype(mxu_dtype)

        # layer 1: (h1, obs_dim) @ (obs_dim, tb) -> (h1, tb), f32 accumulation
        h = jnp.dot(w1_ref[...], x, preferred_element_type=jnp.float32)
        h = jnp.tanh((h + b1_ref[...]).astype(ew_dtype))

        # layer 2: (h2, h1) @ (h1, tb) -> (h2, tb)
        h = jnp.dot(w2_ref[...], h.astype(mxu_dtype),
                    preferred_element_type=jnp.float32)
        h = jnp.tanh((h + b2_ref[...]).astype(ew_dtype)).astype(jnp.float32)

        # layer 3 (out_features == 1): VPU multiply + sublane reduce instead of
        # an M=1 MXU pass; result is already lane-dense (1, tb).
        v = jnp.sum(h * w3_ref[...], axis=0, keepdims=True) + b3_ref[...]
        out_ref[...] = v[None].astype(out_ref.dtype)        # (1, 1, tb)

    return kernel


def mlp_critic_forward(obs, params, *, block_b=8192,
                       mxu_dtype=jnp.bfloat16, ew_dtype=None):
    """obs: (B, obs_dim). params: PyTorch-layout weights w{k}: (out, in),
    biases b{k}: (out, 1). Returns (B,) == torch.squeeze(v_net(obs), -1)."""
    B, obs_dim = obs.shape
    if ew_dtype is None:
        ew_dtype = _default_ew_dtype(mxu_dtype)

    # MXU operands in mxu_dtype; everything elementwise-related stays f32
    # (down-cast to ew_dtype happens inside the kernel where it's cheap).
    w1 = params["w1"].astype(mxu_dtype)                 # (h1, obs_dim)
    w2 = params["w2"].astype(mxu_dtype)                 # (h2, h1)
    b1 = params["b1"].astype(jnp.float32)               # (h1, 1)
    b2 = params["b2"].astype(jnp.float32)               # (h2, 1)
    w3 = params["w3"].reshape(-1, 1).astype(jnp.float32)  # (h2, 1) column
    b3 = params["b3"].reshape(1, 1).astype(jnp.float32)   # (1, 1)

    tb = _pick_tile(B, block_b)
    b_pad = _round_up(B, tb)
    grid_b = b_pad // tb

    # Batch on lanes: transpose once in the wrapper, pad the lane axis.
    obs_t = jnp.transpose(obs)                           # (obs_dim, B)
    if b_pad != B:
        obs_t = jnp.pad(obs_t, ((0, 0), (0, b_pad - B)))

    # Whole-array, VMEM-resident specs for the tiny weights/biases: no re-DMA
    # across grid steps, no (8,128) divisibility pitfalls.
    resident = pl.BlockSpec(memory_space=pltpu.MemorySpace.VMEM)

    out = pl.pallas_call(
        _make_kernel(mxu_dtype, ew_dtype),
        out_shape=jax.ShapeDtypeStruct((grid_b, 1, tb), jnp.float32),
        grid=(grid_b,),
        in_specs=[
            pl.BlockSpec((obs_dim, tb), lambda i: (0, i)),   # obs tile (lanes=batch)
            resident, resident,                              # w1, b1
            resident, resident,                              # w2, b2
            resident, resident,                              # w3 (column), b3
        ],
        out_specs=pl.BlockSpec((1, 1, tb), lambda i: (i, 0, 0)),
        compiler_params=pltpu.CompilerParams(
            dimension_semantics=("parallel",)),
    )(obs_t, w1, b1, w2, b2, w3, b3)

    # flatten tiles back to batch order and drop padding == squeeze(-1)
    return out.reshape(-1)[:B]


def init_params(key, obs_dim, hidden_sizes, dtype=jnp.float32):
    """nn.Linear-style U(-1/sqrt(fan_in), 1/sqrt(fan_in)) init.
    Weights stored PyTorch-style as (out_features, in_features), biases (out, 1)."""
    sizes = [obs_dim] + list(hidden_sizes) + [1]
    params = {}
    for j in range(len(sizes) - 1):
        fan_in, fan_out = sizes[j], sizes[j + 1]
        key, kw, kb = jax.random.split(key, 3)
        bound = 1.0 / float(fan_in) ** 0.5
        params[f"w{j + 1}"] = jax.random.uniform(
            kw, (fan_out, fan_in), jnp.float32, -bound, bound).astype(dtype)
        params[f"b{j + 1}"] = jax.random.uniform(
            kb, (fan_out, 1), jnp.float32, -bound, bound).astype(dtype)
    return params


def reference_forward(obs, params):
    h = jnp.tanh(obs @ params["w1"].T + params["b1"].T)
    h = jnp.tanh(h @ params["w2"].T + params["b2"].T)
    v = h @ params["w3"].T + params["b3"].T
    return jnp.squeeze(v, -1)


if __name__ == "__main__":
    key = jax.random.PRNGKey(0)
    obs_dim, hidden_sizes = 16, (32, 32)   # activation = tanh

    key, kparam = jax.random.split(key)
    params = init_params(kparam, obs_dim, hidden_sizes)

    # 1) small single-tile batch, strict f32 MXU path
    key, k1 = jax.random.split(key)
    obs1 = jax.random.normal(k1, (8, obs_dim), jnp.float32)
    v1 = jax.block_until_ready(
        mlp_critic_forward(obs1, params, mxu_dtype=jnp.float32))
    v1_ref = reference_forward(obs1, params)
    assert v1.shape == (8,), v1.shape
    assert jnp.allclose(v1, v1_ref, atol=1e-4, rtol=1e-4)

    # 2) multi-tile batch (grid of 3): exercises weight residency, padding,
    #    and the parallel batch grid, still on the strict f32 path
    key, k2 = jax.random.split(key)
    obs2 = jax.random.normal(k2, (300, obs_dim), jnp.float32)
    v2 = jax.block_until_ready(
        mlp_critic_forward(obs2, params, block_b=128, mxu_dtype=jnp.float32))
    v2_ref = reference_forward(obs2, params)
    assert v2.shape == (300,), v2.shape
    assert jnp.allclose(v2, v2_ref, atol=1e-4, rtol=1e-4)

    # 3) default fast path: bf16 MXU operands for f32-stored params
    v3 = jax.block_until_ready(mlp_critic_forward(obs2, params, block_b=128))
    assert v3.shape == (300,), v3.shape
    assert jnp.allclose(v3, v2_ref, atol=5e-2, rtol=5e-2)

    # 4) bf16-stored params (weights truncated -> looser tolerance)
    params_bf16 = {k_: p.astype(jnp.bfloat16) for k_, p in params.items()}
    v4 = jax.block_until_ready(
        mlp_critic_forward(obs2, params_bf16, block_b=128))
    assert v4.shape == (300,), v4.shape
    assert jnp.allclose(v4, v2_ref, atol=1e-1, rtol=1e-1)

    print("KERNEL_OK")
</pallas_src>

<mosaic_0001>
module attributes {stable_mosaic.version = 11 : i64} {
  func.func @kernel(%arg0: i32, %arg1: memref<16x8xf32, #tpu.memory_space<vmem>>, %arg2: memref<32x16xf32, #tpu.memory_space<vmem>>, %arg3: memref<32x1xf32, #tpu.memory_space<vmem>>, %arg4: memref<32x32xf32, #tpu.memory_space<vmem>>, %arg5: memref<32x1xf32, #tpu.memory_space<vmem>>, %arg6: memref<32x1xf32, #tpu.memory_space<vmem>>, %arg7: memref<1x1xf32, #tpu.memory_space<vmem>>, %arg8: memref<1x1x8xf32, #tpu.memory_space<vmem>>) attributes {dimension_semantics = [#tpu.dimension_semantics<parallel>], iteration_bounds = array<i64: 1>, scalar_prefetch = 0 : i64, scratch_operands = 0 : i64, tpu.core_type = #tpu.core_type<tc>, window_params = [{transform_indices = @transform_0, window_bounds = array<i64: 16, 8>}, {pipeline_mode = #tpu.pipeline_mode<synchronous>, transform_indices = @transform_1, window_bounds = array<i64: 32, 16>}, {pipeline_mode = #tpu.pipeline_mode<synchronous>, transform_indices = @transform_2, window_bounds = array<i64: 32, 1>}, {pipeline_mode = #tpu.pipeline_mode<synchronous>, transform_indices = @transform_3, window_bounds = array<i64: 32, 32>}, {pipeline_mode = #tpu.pipeline_mode<synchronous>, transform_indices = @transform_4, window_bounds = array<i64: 32, 1>}, {pipeline_mode = #tpu.pipeline_mode<synchronous>, transform_indices = @transform_5, window_bounds = array<i64: 32, 1>}, {pipeline_mode = #tpu.pipeline_mode<synchronous>, transform_indices = @transform_6, window_bounds = array<i64: 1, 1>}, {transform_indices = @transform_7, window_bounds = array<i64: 1, 1, 8>}]} {
    %c0 = arith.constant 0 : index
    %c0_0 = arith.constant 0 : index
    %0 = vector.load %arg1[%c0, %c0_0] : memref<16x8xf32, #tpu.memory_space<vmem>>, vector<16x8xf32>
    %c0_1 = arith.constant 0 : index
    %c0_2 = arith.constant 0 : index
    %1 = vector.load %arg2[%c0_1, %c0_2] : memref<32x16xf32, #tpu.memory_space<vmem>>, vector<32x16xf32>
    %cst = arith.constant dense<0.000000e+00> : vector<32x8xf32>
    %2 = tpu.matmul %1, %0, %cst {dimension_numbers = #tpu.dot_dimension_numbers<[1], [0], [0], [1], [0, 0, 1, 1], [], []>} : vector<32x16xf32>, vector<16x8xf32>, vector<32x8xf32> -> vector<32x8xf32>
    %c0_3 = arith.constant 0 : index
    %c0_4 = arith.constant 0 : index
    %3 = vector.load %arg3[%c0_3, %c0_4] : memref<32x1xf32, #tpu.memory_space<vmem>>, vector<32x1xf32>
    %4 = vector.broadcast %3 : vector<32x1xf32> to vector<32x8xf32>
    %5 = arith.addf %2, %4 : vector<32x8xf32>
    %6 = math.tanh %5 : vector<32x8xf32>
    %c0_5 = arith.constant 0 : index
    %c0_6 = arith.constant 0 : index
    %7 = vector.load %arg4[%c0_5, %c0_6] : memref<32x32xf32, #tpu.memory_space<vmem>>, vector<32x32xf32>
    %cst_7 = arith.constant dense<0.000000e+00> : vector<32x8xf32>
    %8 = tpu.matmul %7, %6, %cst_7 {dimension_numbers = #tpu.dot_dimension_numbers<[1], [0], [0], [1], [0, 0, 1, 1], [], []>} : vector<32x32xf32>, vector<32x8xf32>, vector<32x8xf32> -> vector<32x8xf32>
    %c0_8 = arith.constant 0 : index
    %c0_9 = arith.constant 0 : index
    %9 = vector.load %arg5[%c0_8, %c0_9] : memref<32x1xf32, #tpu.memory_space<vmem>>, vector<32x1xf32>
    %10 = vector.broadcast %9 : vector<32x1xf32> to vector<32x8xf32>
    %11 = arith.addf %8, %10 : vector<32x8xf32>
    %12 = math.tanh %11 : vector<32x8xf32>
    %c0_10 = arith.constant 0 : index
    %c0_11 = arith.constant 0 : index
    %13 = vector.load %arg6[%c0_10, %c0_11] : memref<32x1xf32, #tpu.memory_space<vmem>>, vector<32x1xf32>
    %14 = vector.broadcast %13 : vector<32x1xf32> to vector<32x8xf32>
    %15 = arith.mulf %12, %14 : vector<32x8xf32>
    %cst_12 = arith.constant dense<0.000000e+00> : vector<8xf32>
    %16 = vector.multi_reduction <add>, %15, %cst_12 [0] : vector<32x8xf32> to vector<8xf32>
    %17 = vector.shape_cast %16 : vector<8xf32> to vector<1x8xf32>
    %c0_13 = arith.constant 0 : index
    %c0_14 = arith.constant 0 : index
    %18 = vector.load %arg7[%c0_13, %c0_14] : memref<1x1xf32, #tpu.memory_space<vmem>>, vector<1x1xf32>
    %19 = vector.broadcast %18 : vector<1x1xf32> to vector<1x8xf32>
    %20 = arith.addf %17, %19 : vector<1x8xf32>
    %21 = vector.shape_cast %20 : vector<1x8xf32> to vector<1x1x8xf32>
    %c0_15 = arith.constant 0 : index
    %c0_16 = arith.constant 0 : index
    %c0_17 = arith.constant 0 : index
    %22 = vector.load %arg8[%c0_15, %c0_16, %c0_17] : memref<1x1x8xf32, #tpu.memory_space<vmem>>, vector<1x1x8xf32>
    tpu.vector_store %arg8[%c0_15, %c0_16, %c0_17], %21 {strides = array<i32>} : memref<1x1x8xf32, #tpu.memory_space<vmem>>, vector<1x1x8xf32>,
    return
  }
  func.func @transform_0(%arg0: i32) -> (i32, i32) {
    %c0_i32 = arith.constant 0 : i32
    %c0_i32_0 = arith.constant 0 : i32
    return %c0_i32, %arg0 : i32, i32
  }
  func.func @transform_1(%arg0: i32) -> (i32, i32) {
    %c0_i32 = arith.constant 0 : i32
    %c0_i32_0 = arith.constant 0 : i32
    %c0_i32_1 = arith.constant 0 : i32
    return %c0_i32, %c0_i32_0 : i32, i32
  }
  func.func @transform_2(%arg0: i32) -> (i32, i32) {
    %c0_i32 = arith.constant 0 : i32
    %c0_i32_0 = arith.constant 0 : i32
    %c0_i32_1 = arith.constant 0 : i32
    return %c0_i32, %c0_i32_0 : i32, i32
  }
  func.func @transform_3(%arg0: i32) -> (i32, i32) {
    %c0_i32 = arith.constant 0 : i32
    %c0_i32_0 = arith.constant 0 : i32
    %c0_i32_1 = arith.constant 0 : i32
    return %c0_i32, %c0_i32_0 : i32, i32
  }
  func.func @transform_4(%arg0: i32) -> (i32, i32) {
    %c0_i32 = arith.constant 0 : i32
    %c0_i32_0 = arith.constant 0 : i32
    %c0_i32_1 = arith.constant 0 : i32
    return %c0_i32, %c0_i32_0 : i32, i32
  }
  func.func @transform_5(%arg0: i32) -> (i32, i32) {
    %c0_i32 = arith.constant 0 : i32
    %c0_i32_0 = arith.constant 0 : i32
    %c0_i32_1 = arith.constant 0 : i32
    return %c0_i32, %c0_i32_0 : i32, i32
  }
  func.func @transform_6(%arg0: i32) -> (i32, i32) {
    %c0_i32 = arith.constant 0 : i32
    %c0_i32_0 = arith.constant 0 : i32
    %c0_i32_1 = arith.constant 0 : i32
    return %c0_i32, %c0_i32_0 : i32, i32
  }
  func.func @transform_7(%arg0: i32) -> (i32, i32, i32) {
    %c0_i32 = arith.constant 0 : i32
    %c0_i32_0 = arith.constant 0 : i32
    %c0_i32_1 = arith.constant 0 : i32
    return %arg0, %c0_i32, %c0_i32_0 : i32, i32, i32
  }
}

</mosaic_0001>

<bundles_post_ra>
// kernel: tpu_custom_call.1
= control target key start
LH: loop header
LB: loop body
LE: loop exit
PB: predicated region body
PF: predicated region fallthrough
CT: control target
= control target key end

     0   :  { %s593_s0 = inlined_call_operand.vmem [shape: f32[16,8], index: 0, kind: input, shape index: {}]   ;;  %s594_s1 = inlined_call_operand.vmem [shape: f32[32,16], index: 1, kind: input, shape index: {}]   ;;  %s595_s2 = inlined_call_operand.vmem [shape: f32[32,1], index: 2, kind: input, shape index: {}]   ;;  %s596_s3 = inlined_call_operand.vmem [shape: f32[32,32], index: 3, kind: input, shape index: {}]   ;;  %s597_s4 = inlined_call_operand.vmem [shape: f32[32,1], index: 4, kind: input, shape index: {}]   ;;  %s598_s5 = inlined_call_operand.vmem [shape: f32[32,1], index: 5, kind: input, shape index: {}]   ;;  %s599_s6 = inlined_call_operand.<no memory space> [shape: f32[1,1], index: 6, kind: input, shape index: {}]   ;;  %s600_s7 = inlined_call_operand.hbm [shape: f32[1,1,8], index: 7, kind: output, shape index: {}]  }
   0x1   :  { %v12_v0 = vstv %s599_s6 }
   0x2   :  { %13 = vst [vmem:[#allocation2] sm:$0x1] %v12_v0 }
   0x3   :  { %v29_v1 = vld [vmem:[%s593_s0] sm:$0xff]  ;;  %v30_v2 = vld [vmem:[%s593_s0 + $0x8] sm:$0xff]  ;;  %vm59_vm0 = vcmask 130048   ;;  %v462_v5 = vmov 0   ;;  %v37_v7 = vld [vmem:[%s595_s2 + $0x10] sm:$0xff] }
   0x4   :  { %v31_v3 = vld [vmem:[%s594_s1] sm:$0xff]  ;;  %v406_v4 = vpack.c.bf16 %v30_v2, %v29_v1  ;;  %420 = vset.pattern.permute.xlu0 %v462_v5  ;;  %421 = vset.pattern.permute.xlu1 %v462_v5  ;;  %v32_v8 = vld [vmem:[%s594_s1 + $0x8] sm:$0xff]  ;;  %v33_v10 = vld [vmem:[%s594_s1 + $0x10] sm:$0xff] }
   0x5   :  { %386 = vmatprep.mubr.msk.f32.mxu0 %vm59_vm0, %v31_v3  ;;  %v35_v6 = vld [vmem:[%s595_s2] sm:$0xff]  ;;  %v36_v9 = vld [vmem:[%s595_s2 + $0x8] sm:$0xff]  ;;  %51 = vperm.xlu1 %421, %v37_v7   ;;  %v38_v11 = vld [vmem:[%s595_s2 + $0x18] sm:$0xff] }
   0x6   :  { %407 = vmatprep.subr.bf16.mxu0 %v406_v4  ;;  %41 = vperm.xlu0 %420, %v35_v6  }
   0x7   :  { %409 = vmatpush3.bf16.msra.mxu0 %v406_v4 }
   0x8   :  { %14 = vsyncpa [#allocation4], 0  ;;  %v34_v12 = vld [vmem:[%s594_s1 + $0x18] sm:$0xff]  ;;  %v165_v13 = vld [vmem:[%s597_s4] sm:$0xff]  ;;  %vm189_vm1 = vcmask 261120   ;;  %vm319_vm2 = vcmask 64512  }
   0x9   :  { %56 = vperm.xlu1 %421, %v38_v11   ;;  %v166_v14 = vld [vmem:[%s597_s4 + $0x8] sm:$0xff]  ;;  %v167_v15 = vld [vmem:[%s597_s4 + $0x10] sm:$0xff]  ;;  %v168_v16 = vld [vmem:[%s597_s4 + $0x18] sm:$0xff]  ;;  %vm344_vm3 = vcmask 57344  }
   0xa   :  { %387 = vmatmul.mubr.msk.f32.vlgmr.msra.gmra.mrb[0].mxu0 %vm59_vm0, %v32_v8  ;;  %46 = vperm.xlu0 %420, %v36_v9   ;;  %v291_v17 = vld [vmem:[%s598_s5] sm:$0xff]  ;;  %v292_v18 = vld [vmem:[%s598_s5 + $0x8] sm:$0xff]  ;;  %v293_v19 = vld [vmem:[%s598_s5 + $0x10] sm:$0xff] }
   0xb   :  { %389 = vmatprep.mubr.msk.f32.mxu0 %vm59_vm0, %v33_v10  ;;  %v294_v20 = vld [vmem:[%s598_s5 + $0x18] sm:$0xff]  ;;  %v333_v21 = vld [vmem:[#allocation2] sm:$0x1]  ;;  %v162_v41 = vld [vmem:[%s596_s3 + $0x8] sm:$0xff]  ;;  %v339_v10 = vlaneseq }
   0xc   :  { %v161_v22 = vld [vmem:[%s596_s3] sm:$0xff]  ;;  %v163_v42 = vld [vmem:[%s596_s3 + $0x10] sm:$0xff]  ;;  %v164_v43 = vld [vmem:[%s596_s3 + $0x18] sm:$0xff]  ;;  %s463_s3 = smov [#allocation3]  }
   0xd   :  { %176 = vperm.xlu1 %421, %v166_v14   ;;  %400 = vmatprep.mubr.msk.f32.mxu1 %vm189_vm1, %v161_v22  ;;  %s352_s16 = sshll.u32 %s463_s3, 4  ;;  %s353_s16 = int_to_ptr.vmem [resolvable:$true] %s352_s16 }
   0xe   :  { %390 = vmatmul.mubr.msk.f32.gmra.mrb[2].mxu0 %vm59_vm0, %v34_v12  ;;  %171 = vperm.xlu0 %420, %v165_v13   ;;  %v340_v13 = vshrl.u32 %v339_v10, 7  ;;  %s438_s17 = scalar_lea.vmem %s353_s16, 16  ;;  %s442_s18 = scalar_lea.vmem %s353_s16, 32 }
   0xf   :  { %p439_p0 = scmp.ne.s32.totalorder %s353_s16, %s438_s17  ;;  %p443_p1 = scmp.lt.s32.totalorder %s353_s16, %s353_s16 }
  0x10   :  { %p444_p2 = scmp.lt.s32.totalorder %s442_s18, %s438_s17 }
  0x11   :  { %186 = vperm.xlu1 %421, %v168_v16   ;;  %v341_v16 = vsub.s32 0, %v340_v13 }
  0x12   :  { %181 = vperm.xlu0 %420, %v167_v15   ;;  %p445_p3 = por %p444_p2, %p443_p1 }
  0x14   :  { %p446_p4 = pnand %p445_p3, %p439_p0 }
  0x15   :  { %302 = vperm.xlu1 %421, %v292_v18  }
  0x16   :  { %297 = vperm.xlu0 %420, %v291_v17  }
  0x19   :  { %312 = vperm.xlu1 %421, %v294_v20  }
  0x1a   :  { %307 = vperm.xlu0 %420, %v293_v19  }
  0x1e   :  { %336 = vperm.xlu0 %420, %v333_v21  }
  0x84   :  { %v52_v24 = vpop.permute.xlu1 %51 }
  0x85   :  { %v42_v23 = vpop.permute.xlu0 %41 }
  0x88   :  { %v57_v30 = vpop.permute.xlu1 %56 }
  0x89   :  { %v47_v25 = vpop.permute.xlu0 %46 }
  0x8c   :  { %v177_v44 = vpop.permute.xlu1 %176 }
  0x8d   :  { %v172_v45 = vpop.permute.xlu0 %171 }
  0x90   :  { %v187_v50 = vpop.permute.xlu1 %186 }
  0x91   :  { %v182_v52 = vpop.permute.xlu0 %181 }
  0x94   :  { %v303_v57 = vpop.permute.xlu1 %302 }
  0x95   :  { %v298_v56 = vpop.permute.xlu0 %297 }
  0x98   :  { %v313_v3 = vpop.permute.xlu1 %312 }
  0x99   :  { %v308_v2 = vpop.permute.xlu0 %307 }
  0x9d   :  { %v337_v18 = vpop.permute.xlu0 %336 }
  0x9e   :  { %v342_v20 = vrot.slane %v337_v18, %v341_v16 }
  0xdd   :  { %v388_v26 = vpop.f32.mrb[0].mxu0 }
  0xde   :  { %v144_v27 = vadd.f32 %v388_v26, %v47_v25  ;;  %v138_v28 = vpop.f32.mrb[1].mxu0 }
  0xdf   :  { %v139_v29 = vadd.f32 %v138_v28, %v42_v23 }
  0xe0   :  { %422 = vtanh.f32 %v144_v27 }
  0xe1   :  { %424 = vtanh.f32 %v139_v29  ;;  %v391_v31 = vpop.f32.mrb[2].mxu0 }
  0xe2   :  { %v154_v32 = vadd.f32 %v391_v31, %v57_v30  ;;  %v148_v33 = vpop.f32.mrb[3].mxu0 }
  0xe3   :  { %v149_v34 = vadd.f32 %v148_v33, %v52_v24 }
  0xe4   :  { %426 = vtanh.f32 %v154_v32 }
  0xe5   :  { %428 = vtanh.f32 %v149_v34 }
  0xea   :  { %v423_v35 = vpop.eup %422 }
  0xeb   :  { %v425_v36 = vpop.eup %424 }
  0xec   :  { %v410_v37 = vpack.c.bf16 %v423_v35, %v425_v36 }
  0xee   :  { %v427_v38 = vpop.eup %426  ;;  %411 = vmatprep.subr.bf16.mxu1 %v410_v37 }
  0xef   :  { %v429_v39 = vpop.eup %428  ;;  %413 = vmatpush3.bf16.msra.mxu1 %v410_v37 }
  0xf0   :  { %v414_v40 = vpack.c.bf16 %v427_v38, %v429_v39 }
  0xf2   :  { %415 = vmatprep.subr.bf16.mxu1 %v414_v40 }
  0xf3   :  { %417 = vmatpush3.bf16.msra.mxu1 %v414_v40 }
  0xf6   :  { %401 = vmatmul.mubr.msk.f32.vlgmr.msra.gmra.mrb[0].mxu1 %vm189_vm1, %v162_v41 }
  0xf7   :  { %403 = vmatprep.mubr.msk.f32.mxu1 %vm189_vm1, %v163_v42 }
  0xfa   :  { %404 = vmatmul.mubr.msk.f32.gmra.mrb[2].mxu1 %vm189_vm1, %v164_v43 }
 0x1c9   :  { %v402_v46 = vpop.f32.mrb[0].mxu1 }
 0x1ca   :  { %v274_v47 = vadd.f32 %v402_v46, %v177_v44  ;;  %v268_v48 = vpop.f32.mrb[1].mxu1 }
 0x1cb   :  { %v269_v49 = vadd.f32 %v268_v48, %v172_v45 }
 0x1cc   :  { %430 = vtanh.f32 %v274_v47 }
 0x1cd   :  { %432 = vtanh.f32 %v269_v49  ;;  %v405_v51 = vpop.f32.mrb[2].mxu1 }
 0x1ce   :  { %v284_v53 = vadd.f32 %v405_v51, %v187_v50  ;;  %v278_v54 = vpop.f32.mrb[3].mxu1 }
 0x1cf   :  { %v279_v55 = vadd.f32 %v278_v54, %v182_v52 }
 0x1d0   :  { %434 = vtanh.f32 %v284_v53 }
 0x1d1   :  { %436 = vtanh.f32 %v279_v55 }
 0x1d6   :  { %v431_v58 = vpop.eup %430 }
 0x1d7   :  { %v433_v59 = vpop.eup %432  ;;  %v316_v60 = vmul.f32 %v431_v58, %v303_v57 }
 0x1d8   :  { %v315_v61 = vmul.f32 %v433_v59, %v298_v56 }
 0x1d9   :  { %v321_v62 = vsel %vm319_vm2, %v316_v60, 0.0 }
 0x1da   :  { %v435_v63 = vpop.eup %434  ;;  %v320_v0 = vsel %vm319_vm2, %v315_v61, 0.0 }
 0x1db   :  { %v437_v1 = vpop.eup %436  ;;  %v322_v4 = vadd.f32 %v321_v62, %v320_v0  ;;  %v318_v5 = vmul.f32 %v435_v63, %v313_v3 }
 0x1dc   :  { %v317_v6 = vmul.f32 %v437_v1, %v308_v2 }
 0x1dd   :  { %v325_v9 = vsel %vm319_vm2, %v318_v5, 0.0 }
 0x1de   :  { %v323_v7 = vsel %vm319_vm2, %v317_v6, 0.0 }
 0x1df   :  { %v324_v8 = vadd.f32 %v323_v7, %v322_v4 }
 0x1e1   :  { %v326_v11 = vadd.f32 %v325_v9, %v324_v8 }
 0x1e3   :  { %v327_v12 = vrot.slane %v326_v11, 4 }
 0x1e5   :  { %v328_v14 = vadd.f32 %v327_v12, %v326_v11 }
 0x1e7   :  { %v329_v15 = vrot.slane %v328_v14, 2 }
 0x1e9   :  { %v330_v17 = vadd.f32 %v329_v15, %v328_v14 }
 0x1eb   :  { %v331_v19 = vrot.slane %v330_v17, 1 }
 0x1ed   :  { %v332_v21 = vadd.f32 %v331_v19, %v330_v17 }
 0x1ef   :  { %v343_v22 = vadd.f32 %v342_v20, %v332_v21 }
 0x1f1   :  { %345 = vst.msk [vmem:[#allocation3] sm:$0x1] %vm344_vm3, %v343_v22 }
 0x1f2   :  { %449 = shalt.err (!%p446_p4)
}
 0x1f3   :  { %s450_s21 = scalar_lea.hbm %s600_s7, 16 }
 0x1f4   :  { %p451_p5 = scmp.ne.s32.totalorder %s600_s7, %s450_s21  ;;  %p454_p6 = scmp.lt.u32.totalorder %s450_s21, %s600_s7 }
 0x1f6   :  { %p456_p7 = pnand %p454_p6, %p451_p5 }
 0x1f8   :  { %459 = shalt.err (!%p456_p7)
}
 0x1f9   :  { %355 = dma.vmem_to_hbm [thread:$0]  %s353_s16, 16, %s600_s7, [#allocation4]  }
 0x1fa   :  { %460 = dma.done.wait [#allocation4], 16  }
 0x1fb   :  { %461 = vsyncadd [#allocation4], 4294967280 }
 0x1fc   :  { %359 = vsyncpa [#allocation4], 1 }

</bundles_post_ra>
